<compile_context>
chip_gen: v5e
topology: v5e:2x2
jax: 0.10.0
libtpu: 0.0.40
codegen_flags: <defaults>
</compile_context>

<pallas_src>
import math

import jax
import jax.numpy as jnp
from jax.experimental import pallas as pl
from jax.experimental.pallas import tpu as pltpu

_LANES = 128            # vreg lane width: last dim is a full lane multiple
_SUBLANES = 8           # f32 sublane packing
_MAX_BLOCK_ROWS = 1024  # (1024, 128) f32 block = 512 KiB; 2x double-buffered in+out ~ 2 MiB


def _mish_kernel(x_ref, o_ref):
    # Elementwise mish(x) = x * tanh(softplus(x)), computed in f32.
    x = x_ref[...].astype(jnp.float32)
    # Numerically stable softplus: max(x, 0) + log(1 + exp(-|x|)).
    sp = jnp.maximum(x, 0.0) + jnp.log(1.0 + jnp.exp(-jnp.abs(x)))
    o_ref[...] = (x * jnp.tanh(sp)).astype(o_ref.dtype)


def _round_up(n, m):
    return ((n + m - 1) // m) * m


def mish(x):
    """Elementwise mish(x) = x * tanh(ln(1 + exp(x))). Any shape, float dtype."""
    orig_shape = x.shape
    orig_dtype = x.dtype
    total = math.prod(orig_shape) if orig_shape else 1

    # Flatten and re-tile into a lane-dense (rows, 128) layout.
    rows = max(1, -(-total // _LANES))
    block_rows = min(_MAX_BLOCK_ROWS, _round_up(rows, _SUBLANES))
    padded_rows = _round_up(rows, block_rows)
    padded_total = padded_rows * _LANES

    x_flat = jnp.ravel(x)
    if padded_total != total:
        x_flat = jnp.pad(x_flat, (0, padded_total - total))
    x2d = x_flat.reshape(padded_rows, _LANES)

    grid = (padded_rows // block_rows,)
    bytes_per_elem = jnp.dtype(orig_dtype).itemsize
    cost = pl.CostEstimate(
        flops=5 * total,
        transcendentals=3 * total,              # exp, log, tanh per element
        bytes_accessed=2 * total * bytes_per_elem,
    )

    out2d = pl.pallas_call(
        _mish_kernel,
        out_shape=jax.ShapeDtypeStruct((padded_rows, _LANES), orig_dtype),
        grid=grid,
        in_specs=[pl.BlockSpec((block_rows, _LANES), lambda i: (i, 0))],
        out_specs=pl.BlockSpec((block_rows, _LANES), lambda i: (i, 0)),
        compiler_params=pltpu.CompilerParams(
            dimension_semantics=("parallel",),  # v7x: both TCs split the row blocks
        ),
        cost_estimate=cost,
    )(x2d)

    out_flat = out2d.reshape(-1)
    if padded_total != total:
        out_flat = out_flat[:total]
    return out_flat.reshape(orig_shape)


def _reference(x):
    """Plain-JAX reference matching the PyTorch forward."""
    return x * jnp.tanh(jax.nn.softplus(x))


if __name__ == "__main__":
    key = jax.random.PRNGKey(0)
    # Shape consistent with the module's (N, *) contract; module-scale test size.
    x = jax.random.normal(key, (2, 4, 16, 16), dtype=jnp.float32) * 3.0

    out = jax.block_until_ready(mish(x))
    ref = _reference(x)

    assert out.shape == x.shape
    assert out.dtype == x.dtype
    assert jnp.allclose(out, ref, atol=1e-5, rtol=1e-5)

    print("KERNEL_OK")
</pallas_src>

<mosaic_0001>
module attributes {stable_mosaic.version = 11 : i64} {
  func.func @_mish_kernel(%arg0: i32, %arg1: memref<16x128xf32, #tpu.memory_space<vmem>>, %arg2: memref<16x128xf32, #tpu.memory_space<vmem>>) attributes {dimension_semantics = [#tpu.dimension_semantics<parallel>], iteration_bounds = array<i64: 1>, scalar_prefetch = 0 : i64, scratch_operands = 0 : i64, tpu.core_type = #tpu.core_type<tc>, window_params = [{transform_indices = @transform_0, window_bounds = array<i64: 16, 128>}, {transform_indices = @transform_1, window_bounds = array<i64: 16, 128>}]} {
    %c0 = arith.constant 0 : index
    %c0_0 = arith.constant 0 : index
    %0 = vector.load %arg1[%c0, %c0_0] : memref<16x128xf32, #tpu.memory_space<vmem>>, vector<16x128xf32>
    %cst = arith.constant 0.000000e+00 : f32
    %1 = vector.broadcast %cst : f32 to vector<16x128xf32>
    %2 = arith.maximumf %0, %1 : vector<16x128xf32>
    %3 = math.absf %0 : vector<16x128xf32>
    %cst_1 = arith.constant 0.000000e+00 : f32
    %4 = vector.broadcast %cst_1 : f32 to vector<16x128xf32>
    %5 = arith.subf %4, %3 : vector<16x128xf32>
    %6 = math.exp %5 : vector<16x128xf32>
    %cst_2 = arith.constant 1.000000e+00 : f32
    %7 = vector.broadcast %cst_2 : f32 to vector<16x128xf32>
    %8 = arith.addf %7, %6 : vector<16x128xf32>
    %9 = math.log %8 : vector<16x128xf32>
    %10 = arith.addf %2, %9 : vector<16x128xf32>
    %11 = math.tanh %10 : vector<16x128xf32>
    %12 = arith.mulf %0, %11 : vector<16x128xf32>
    %c0_3 = arith.constant 0 : index
    %c0_4 = arith.constant 0 : index
    %13 = vector.load %arg2[%c0_3, %c0_4] : memref<16x128xf32, #tpu.memory_space<vmem>>, vector<16x128xf32>
    tpu.vector_store %arg2[%c0_3, %c0_4], %12 {strides = array<i32>} : memref<16x128xf32, #tpu.memory_space<vmem>>, vector<16x128xf32>,
    return
  }
  func.func @transform_0(%arg0: i32) -> (i32, i32) {
    %c0_i32 = arith.constant 0 : i32
    %c0_i32_0 = arith.constant 0 : i32
    return %arg0, %c0_i32 : i32, i32
  }
  func.func @transform_1(%arg0: i32) -> (i32, i32) {
    %c0_i32 = arith.constant 0 : i32
    %c0_i32_0 = arith.constant 0 : i32
    return %arg0, %c0_i32 : i32, i32
  }
}

</mosaic_0001>

<bundles_post_ra>
// kernel: tpu_custom_call.1
= control target key start
LH: loop header
LB: loop body
LE: loop exit
PB: predicated region body
PF: predicated region fallthrough
CT: control target
= control target key end

     0   :  { %6 = vsyncpa [#allocation3], 0  ;;  %s164_s0 = inlined_call_operand.hbm [shape: f32[16,128], index: 0, kind: input, shape index: {}]   ;;  %s165_s1 = inlined_call_operand.hbm [shape: f32[16,128], index: 1, kind: output, shape index: {}]  }
   0x1   :  { %7 = vsyncpa [#allocation4], 0  ;;  %s12_s8 = sshll.u32 %s164_s0, 4  ;;  %s138_s9 = smov [#allocation2]   ;;  %s13_s8 = int_to_ptr.hbm [resolvable:$true] %s12_s8 }
   0x2   :  { %s14_s10 = sshll.u32 %s138_s9, 4  ;;  %s139_s11 = smov 128   ;;  %s15_s10 = int_to_ptr.vmem [resolvable:$true] %s14_s10 }
   0x3   :  { %s140_s12 = smov 8  }
   0x4   :  { %20 = dma.hbm_to_vmem [thread:$0]  %s13_s8, 256, %s15_s10, [#allocation3], %s139_s11, %s139_s11, %s140_s12  }
   0x5   :  { %134 = dma.done.wait [#allocation3], 256  }
   0x6   :  { %135 = vsyncadd [#allocation3], 4294967040  ;;  %v25_v0 = vld [vmem:[#allocation2] sm:$0xff]  ;;  %v26_v1 = vld [vmem:[#allocation2 + $0x8] sm:$0xff]  ;;  %s141_s0 = smov [#allocation5]   ;;  %s57_s16 = sshll.u32 %s165_s1, 4  ;;  %s58_s16 = int_to_ptr.hbm [resolvable:$true] %s57_s16 }
   0x7   :  { %v29_v2 = vand.u32 2147483647, %v25_v0  ;;  %v30_v3 = vand.u32 2147483647, %v26_v1  ;;  %v27_v12 = vmax.f32 %v25_v0, 0.0  ;;  %v28_v14 = vmax.f32 %v26_v1, 0.0 }
   0x8   :  { %s55_s13 = sshll.u32 %s141_s0, 4  ;;  %s56_s13 = int_to_ptr.vmem [resolvable:$true] %s55_s13 }
   0x9   :  { %v31_v4 = vsub.f32 0.0, %v29_v2  ;;  %v32_v5 = vsub.f32 0.0, %v30_v3 }
   0xb   :  { %v33_v6 = vmul.f32 1.442695, %v31_v4  ;;  %v35_v7 = vmul.f32 1.442695, %v32_v5 }
   0xd   :  { %74 = vpow2.f32 %v33_v6 }
   0xe   :  { %76 = vpow2.f32 %v35_v7 }
  0x13   :  { %v75_v8 = vpop.eup %74 }
  0x14   :  { %v77_v9 = vpop.eup %76  ;;  %v37_v10 = vadd.f32 1.0, %v75_v8 }
  0x15   :  { %v38_v11 = vadd.f32 1.0, %v77_v9 }
  0x16   :  { %78 = vlog2.f32 %v37_v10 }
  0x17   :  { %80 = vlog2.f32 %v38_v11 }
  0x1c   :  { %v79_v13 = vpop.eup %78 }
  0x1d   :  { %v81_v15 = vpop.eup %80  ;;  %v40_v16 = vmul.f32 0.6931472, %v79_v13 }
  0x1e   :  { %v42_v17 = vmul.f32 0.6931472, %v81_v15 }
  0x1f   :  { %v43_v18 = vadd.f32 %v40_v16, %v27_v12 }
  0x20   :  { %v44_v19 = vadd.f32 %v42_v17, %v28_v14 }
  0x21   :  { %82 = vtanh.f32 %v43_v18 }
  0x22   :  { %84 = vtanh.f32 %v44_v19 }
  0x27   :  { %v83_v20 = vpop.eup %82 }
  0x28   :  { %v85_v21 = vpop.eup %84  ;;  %v47_v22 = vmul.f32 %v83_v20, %v25_v0 }
  0x29   :  { %v48_v23 = vmul.f32 %v85_v21, %v26_v1 }
  0x2a   :  { %49 = vst [vmem:[#allocation5] sm:$0xff] %v47_v22 }
  0x2b   :  { %50 = vst [vmem:[#allocation5 + $0x8] sm:$0xff] %v48_v23 }
  0x2c   :  { %63 = dma.vmem_to_hbm [thread:$0]  %s56_s13, 256, %s58_s16, [#allocation4], %s139_s11, %s139_s11, %s140_s12  }
  0x2d   :  { %136 = dma.done.wait [#allocation4], 256  }
  0x2e   :  { %137 = vsyncadd [#allocation4], 4294967040 }
  0x2f   :  { %68 = vsyncpa [#allocation3], 1 }
  0x30   :  { %69 = vsyncpa [#allocation4], 1 }

</bundles_post_ra>
